<compile_context>
chip_gen: v7x
topology: tpu7x:2x2x1
jax: 0.10.0
libtpu: 0.0.40
codegen_flags: <defaults>
</compile_context>

<pallas_src>
import math

import jax
import jax.numpy as jnp
from jax.experimental import pallas as pl
from jax.experimental.pallas import tpu as pltpu


def _round_up(x, m):
    return ((x + m - 1) // m) * m


def _pick_tile(padded_dim, candidates):
    """Largest candidate tile that evenly divides the (128-aligned) padded dim."""
    for c in candidates:
        if padded_dim % c == 0:
            return c
    return padded_dim


def _gcn_kernel(x_ref, adj_ref, w_ref, o_ref, acc_ref):
    # x_ref:   (TB, TK, Fin)  compute dtype (bf16)
    # adj_ref: (TI, TK)
    # w_ref:   (Fin, TJ)
    # o_ref:   (TB, TI, TJ)   output dtype
    # acc_ref: (TB, TI, TJ)   f32 scratch accumulator (resident across k)
    k = pl.program_id(3)

    @pl.when(k == 0)
    def _():
        acc_ref[...] = jnp.zeros_like(acc_ref)

    adj_t = adj_ref[...]
    w_t = w_ref[...]
    tb = x_ref.shape[0]
    for b in range(tb):  # small static batch tile -> fully unrolled; adj tile reused
        # support chunk: (TK, Fin) @ (Fin, TJ) -> (TK, TJ), f32 accumulation on MXU
        support = jnp.dot(x_ref[b, :, :], w_t, preferred_element_type=jnp.float32)
        # feed the second MXU pass in the compute dtype (bf16), accumulate in f32
        support = support.astype(w_t.dtype)
        acc_ref[b, :, :] = acc_ref[b, :, :] + jnp.dot(
            adj_t, support, preferred_element_type=jnp.float32)

    @pl.when(k == pl.num_programs(3) - 1)
    def _():
        o_ref[...] = acc_ref[...].astype(o_ref.dtype)


def _gcn_kernel_bias(x_ref, adj_ref, w_ref, b_ref, o_ref, acc_ref):
    k = pl.program_id(3)

    @pl.when(k == 0)
    def _():
        acc_ref[...] = jnp.zeros_like(acc_ref)

    adj_t = adj_ref[...]
    w_t = w_ref[...]
    tb = x_ref.shape[0]
    for b in range(tb):
        support = jnp.dot(x_ref[b, :, :], w_t, preferred_element_type=jnp.float32)
        support = support.astype(w_t.dtype)
        acc_ref[b, :, :] = acc_ref[b, :, :] + jnp.dot(
            adj_t, support, preferred_element_type=jnp.float32)

    @pl.when(k == pl.num_programs(3) - 1)
    def _():
        # bias add + final cast in f32 on the VPU; (1, TJ) broadcasts over (TB, TI, TJ)
        out = acc_ref[...] + b_ref[...].astype(jnp.float32)
        o_ref[...] = out.astype(o_ref.dtype)


def graph_convolution(x, adj, weight, bias=None, *, compute_dtype=jnp.bfloat16):
    """Pallas GCN layer forward: adj @ (x @ weight) (+ bias).

    x:      (B, N, Fin)
    adj:    (N, N)         shared across batch (torch matmul broadcasting)
    weight: (Fin, Fout)
    bias:   (1, 1, Fout) or None
    returns (B, N, Fout) in x.dtype
    """
    B, N, Fin = x.shape
    Fin_w, Fout = weight.shape
    assert Fin == Fin_w
    assert adj.shape == (N, N)
    out_dtype = x.dtype

    # ---- pad node / out-feature dims to multiples of 128 (lane-dense tiles) ----
    Np = _round_up(N, 128)
    Fp = _round_up(Fout, 128)

    TI = _pick_tile(Np, (256, 128))         # adj / output row tile (sublane)
    TK = _pick_tile(Np, (512, 256, 128))    # node-contraction tile of adj @ support
    TJ = _pick_tile(Fp, (256, 128))         # out-feature (lane) tile

    # Batch tile: reuse one resident adj tile across TB batch elements, subject
    # to a small VMEM budget for the streamed x tile (double buffered).
    TB = 1
    for cand in (4, 2, 1):
        if B % cand == 0 and cand * TK * Fin * 2 <= 8 * 1024 * 1024:
            TB = cand
            break

    # ---- bf16 MXU operands (halves adj HBM traffic); f32 accumulation in-kernel ----
    xc = x.astype(compute_dtype)
    adjc = adj.astype(compute_dtype)
    wc = weight.astype(compute_dtype)
    if Np != N:
        xc = jnp.pad(xc, ((0, 0), (0, Np - N), (0, 0)))
        adjc = jnp.pad(adjc, ((0, Np - N), (0, Np - N)))
    if Fp != Fout:
        wc = jnp.pad(wc, ((0, 0), (0, Fp - Fout)))

    grid = (B // TB, Np // TI, Fp // TJ, Np // TK)  # reduction axis k innermost

    x_spec = pl.BlockSpec((TB, TK, Fin), lambda b, i, j, k: (b, k, 0))
    adj_spec = pl.BlockSpec((TI, TK), lambda b, i, j, k: (i, k))
    w_spec = pl.BlockSpec((Fin, TJ), lambda b, i, j, k: (0, j))
    o_spec = pl.BlockSpec((TB, TI, TJ), lambda b, i, j, k: (b, i, j))

    out_shape = jax.ShapeDtypeStruct((B, Np, Fp), out_dtype)
    scratch_shapes = [pltpu.VMEM((TB, TI, TJ), jnp.float32)]

    compiler_params = pltpu.CompilerParams(
        dimension_semantics=("parallel", "parallel", "parallel", "arbitrary"),
        vmem_limit_bytes=48 * 1024 * 1024,  # fits v7x (64 MiB) and v5e/v6e (128 MiB)
    )

    if bias is None:
        out = pl.pallas_call(
            _gcn_kernel,
            out_shape=out_shape,
            grid=grid,
            in_specs=[x_spec, adj_spec, w_spec],
            out_specs=o_spec,
            scratch_shapes=scratch_shapes,
            compiler_params=compiler_params,
        )(xc, adjc, wc)
    else:
        bias2d = bias.reshape(1, Fout).astype(jnp.float32)  # keep bias in f32
        if Fp != Fout:
            bias2d = jnp.pad(bias2d, ((0, 0), (0, Fp - Fout)))
        b_spec = pl.BlockSpec((1, TJ), lambda b, i, j, k: (0, j))
        out = pl.pallas_call(
            _gcn_kernel_bias,
            out_shape=out_shape,
            grid=grid,
            in_specs=[x_spec, adj_spec, w_spec, b_spec],
            out_specs=o_spec,
            scratch_shapes=scratch_shapes,
            compiler_params=compiler_params,
        )(xc, adjc, wc, bias2d)

    return out[:, :N, :Fout]


def init_params(key, in_features, out_features, bias=False, dtype=jnp.float32):
    """Mirror GraphConvolution.reset_parameters(): uniform(-stdv, stdv),
    stdv = 1/sqrt(out_features)."""
    stdv = 1.0 / math.sqrt(out_features)
    kw, kb = jax.random.split(key)
    weight = jax.random.uniform(
        kw, (in_features, out_features), dtype=dtype, minval=-stdv, maxval=stdv
    )
    if bias:
        b = jax.random.uniform(
            kb, (1, 1, out_features), dtype=dtype, minval=-stdv, maxval=stdv
        )
    else:
        b = None
    return weight, b


if __name__ == "__main__":
    key = jax.random.PRNGKey(0)
    k_x, k_adj, k_param, k_x2, k_adj2, k_param2 = jax.random.split(key, 6)

    # ---- module-scale demo shapes ----
    B, N, Fin, Fout = 2, 8, 16, 32

    x = jax.random.normal(k_x, (B, N, Fin), dtype=jnp.float32)
    adj_raw = jax.random.uniform(k_adj, (N, N), dtype=jnp.float32)
    adj = adj_raw / jnp.sum(adj_raw, axis=-1, keepdims=True)  # row-normalized graph

    # bias=False path (module default)
    weight, _ = init_params(k_param, Fin, Fout, bias=False)
    out = jax.block_until_ready(graph_convolution(x, adj, weight, bias=None))
    ref = adj @ (x @ weight)
    assert out.shape == (B, N, Fout)
    assert jnp.allclose(out, ref, atol=2e-2, rtol=2e-2), float(jnp.max(jnp.abs(out - ref)))

    # bias=True path
    weight_b, bias_b = init_params(k_param, Fin, Fout, bias=True)
    out_b = jax.block_until_ready(graph_convolution(x, adj, weight_b, bias=bias_b))
    ref_b = adj @ (x @ weight_b) + bias_b
    assert jnp.allclose(out_b, ref_b, atol=2e-2, rtol=2e-2)

    # ---- ragged / multi-tile shapes: exercises padding, the k-accumulator and
    #      multiple row/batch grid steps ----
    B2, N2, Fin2, Fout2 = 3, 384, 48, 160
    x2 = jax.random.normal(k_x2, (B2, N2, Fin2), dtype=jnp.float32)
    adj2_raw = jax.random.uniform(k_adj2, (N2, N2), dtype=jnp.float32)
    adj2 = adj2_raw / jnp.sum(adj2_raw, axis=-1, keepdims=True)
    weight2, bias2 = init_params(k_param2, Fin2, Fout2, bias=True)
    out2 = jax.block_until_ready(graph_convolution(x2, adj2, weight2, bias=bias2))
    ref2 = adj2 @ (x2 @ weight2) + bias2
    assert out2.shape == (B2, N2, Fout2)
    assert jnp.allclose(out2, ref2, atol=2e-2, rtol=2e-2), float(jnp.max(jnp.abs(out2 - ref2)))

    print("KERNEL_OK")
</pallas_src>

<mosaic_0001>
module attributes {stable_mosaic.version = 11 : i64} {
  func.func @_gcn_kernel(%arg0: i32, %arg1: i32, %arg2: i32, %arg3: i32, %arg4: memref<2x128x16xbf16, #tpu.memory_space<vmem>>, %arg5: memref<128x128xbf16, #tpu.memory_space<vmem>>, %arg6: memref<16x128xbf16, #tpu.memory_space<vmem>>, %arg7: memref<2x128x128xf32, #tpu.memory_space<vmem>>, %arg8: memref<2x128x128xf32, #tpu.memory_space<vmem>>) attributes {dimension_semantics = [#tpu.dimension_semantics<parallel>, #tpu.dimension_semantics<parallel>, #tpu.dimension_semantics<parallel>, #tpu.dimension_semantics<arbitrary>], iteration_bounds = array<i64: 1, 1, 1, 1>, scalar_prefetch = 0 : i64, scratch_operands = 1 : i64, tpu.core_type = #tpu.core_type<tc>, window_params = [{transform_indices = @transform_0, window_bounds = array<i64: 2, 128, 16>}, {transform_indices = @transform_1, window_bounds = array<i64: 128, 128>}, {transform_indices = @transform_2, window_bounds = array<i64: 16, 128>}, {transform_indices = @transform_3, window_bounds = array<i64: 2, 128, 128>}]} {
    %c0_i32 = arith.constant 0 : i32
    %0 = arith.cmpi eq, %arg3, %c0_i32 : i32
    %1 = arith.extui %0 : i1 to i32
    %c0_i32_0 = arith.constant 0 : i32
    %2 = arith.cmpi ne, %1, %c0_i32_0 : i32
    scf.if %2 {
      %cst_26 = arith.constant 0.000000e+00 : f32
      %30 = vector.broadcast %cst_26 : f32 to vector<2x128x128xf32>
      %c0_27 = arith.constant 0 : index
      %c0_28 = arith.constant 0 : index
      %c0_29 = arith.constant 0 : index
      %31 = vector.load %arg8[%c0_27, %c0_28, %c0_29] : memref<2x128x128xf32, #tpu.memory_space<vmem>>, vector<2x128x128xf32>
      tpu.vector_store %arg8[%c0_27, %c0_28, %c0_29], %30 {strides = array<i32>} : memref<2x128x128xf32, #tpu.memory_space<vmem>>, vector<2x128x128xf32>,
    } else {
    }
    %c0 = arith.constant 0 : index
    %c0_1 = arith.constant 0 : index
    %3 = vector.load %arg5[%c0, %c0_1] : memref<128x128xbf16, #tpu.memory_space<vmem>>, vector<128x128xbf16>
    %c0_2 = arith.constant 0 : index
    %c0_3 = arith.constant 0 : index
    %4 = vector.load %arg6[%c0_2, %c0_3] : memref<16x128xbf16, #tpu.memory_space<vmem>>, vector<16x128xbf16>
    %c0_4 = arith.constant 0 : index
    %c0_5 = arith.constant 0 : index
    %c0_6 = arith.constant 0 : index
    %5 = vector.load %arg4[%c0_4, %c0_5, %c0_6] : memref<2x128x16xbf16, #tpu.memory_space<vmem>>, vector<1x128x16xbf16>
    %6 = vector.shape_cast %5 : vector<1x128x16xbf16> to vector<128x16xbf16>
    %cst = arith.constant dense<0.000000e+00> : vector<128x128xf32>
    %7 = tpu.matmul %6, %4, %cst {dimension_numbers = #tpu.dot_dimension_numbers<[1], [0], [0], [1], [0, 0, 1, 1], [], []>} : vector<128x16xbf16>, vector<16x128xbf16>, vector<128x128xf32> -> vector<128x128xf32>
    %8 = arith.truncf %7 : vector<128x128xf32> to vector<128x128xbf16>
    %c0_7 = arith.constant 0 : index
    %c0_8 = arith.constant 0 : index
    %c0_9 = arith.constant 0 : index
    %9 = vector.load %arg8[%c0_7, %c0_8, %c0_9] : memref<2x128x128xf32, #tpu.memory_space<vmem>>, vector<1x128x128xf32>
    %10 = vector.shape_cast %9 : vector<1x128x128xf32> to vector<128x128xf32>
    %cst_10 = arith.constant dense<0.000000e+00> : vector<128x128xf32>
    %11 = tpu.matmul %3, %8, %cst_10 {dimension_numbers = #tpu.dot_dimension_numbers<[1], [0], [0], [1], [0, 0, 1, 1], [], []>} : vector<128x128xbf16>, vector<128x128xbf16>, vector<128x128xf32> -> vector<128x128xf32>
    %12 = arith.addf %10, %11 : vector<128x128xf32>
    %c0_11 = arith.constant 0 : index
    %c0_12 = arith.constant 0 : index
    %c0_13 = arith.constant 0 : index
    %13 = vector.load %arg8[%c0_11, %c0_12, %c0_13] : memref<2x128x128xf32, #tpu.memory_space<vmem>>, vector<1x128x128xf32>
    %14 = vector.shape_cast %13 : vector<1x128x128xf32> to vector<128x128xf32>
    %15 = vector.shape_cast %12 : vector<128x128xf32> to vector<1x128x128xf32>
    tpu.vector_store %arg8[%c0_11, %c0_12, %c0_13], %15 {strides = array<i32>} : memref<2x128x128xf32, #tpu.memory_space<vmem>>, vector<1x128x128xf32>,
    %c1 = arith.constant 1 : index
    %c0_14 = arith.constant 0 : index
    %c0_15 = arith.constant 0 : index
    %16 = vector.load %arg4[%c1, %c0_14, %c0_15] : memref<2x128x16xbf16, #tpu.memory_space<vmem>>, vector<1x128x16xbf16>
    %17 = vector.shape_cast %16 : vector<1x128x16xbf16> to vector<128x16xbf16>
    %cst_16 = arith.constant dense<0.000000e+00> : vector<128x128xf32>
    %18 = tpu.matmul %17, %4, %cst_16 {dimension_numbers = #tpu.dot_dimension_numbers<[1], [0], [0], [1], [0, 0, 1, 1], [], []>} : vector<128x16xbf16>, vector<16x128xbf16>, vector<128x128xf32> -> vector<128x128xf32>
    %19 = arith.truncf %18 : vector<128x128xf32> to vector<128x128xbf16>
    %c1_17 = arith.constant 1 : index
    %c0_18 = arith.constant 0 : index
    %c0_19 = arith.constant 0 : index
    %20 = vector.load %arg8[%c1_17, %c0_18, %c0_19] : memref<2x128x128xf32, #tpu.memory_space<vmem>>, vector<1x128x128xf32>
    %21 = vector.shape_cast %20 : vector<1x128x128xf32> to vector<128x128xf32>
    %cst_20 = arith.constant dense<0.000000e+00> : vector<128x128xf32>
    %22 = tpu.matmul %3, %19, %cst_20 {dimension_numbers = #tpu.dot_dimension_numbers<[1], [0], [0], [1], [0, 0, 1, 1], [], []>} : vector<128x128xbf16>, vector<128x128xbf16>, vector<128x128xf32> -> vector<128x128xf32>
    %23 = arith.addf %21, %22 : vector<128x128xf32>
    %c1_21 = arith.constant 1 : index
    %c0_22 = arith.constant 0 : index
    %c0_23 = arith.constant 0 : index
    %24 = vector.load %arg8[%c1_21, %c0_22, %c0_23] : memref<2x128x128xf32, #tpu.memory_space<vmem>>, vector<1x128x128xf32>
    %25 = vector.shape_cast %24 : vector<1x128x128xf32> to vector<128x128xf32>
    %26 = vector.shape_cast %23 : vector<128x128xf32> to vector<1x128x128xf32>
    tpu.vector_store %arg8[%c1_21, %c0_22, %c0_23], %26 {strides = array<i32>} : memref<2x128x128xf32, #tpu.memory_space<vmem>>, vector<1x128x128xf32>,
    %c0_i32_24 = arith.constant 0 : i32
    %27 = arith.cmpi eq, %arg3, %c0_i32_24 : i32
    %28 = arith.extui %27 : i1 to i32
    %c0_i32_25 = arith.constant 0 : i32
    %29 = arith.cmpi ne, %28, %c0_i32_25 : i32
    scf.if %29 {
      %c0_26 = arith.constant 0 : index
      %c0_27 = arith.constant 0 : index
      %c0_28 = arith.constant 0 : index
      %30 = vector.load %arg8[%c0_26, %c0_27, %c0_28] : memref<2x128x128xf32, #tpu.memory_space<vmem>>, vector<2x128x128xf32>
      %c0_29 = arith.constant 0 : index
      %c0_30 = arith.constant 0 : index
      %c0_31 = arith.constant 0 : index
      %31 = vector.load %arg7[%c0_29, %c0_30, %c0_31] : memref<2x128x128xf32, #tpu.memory_space<vmem>>, vector<2x128x128xf32>
      tpu.vector_store %arg7[%c0_29, %c0_30, %c0_31], %30 {strides = array<i32>} : memref<2x128x128xf32, #tpu.memory_space<vmem>>, vector<2x128x128xf32>,
    } else {
    }
    return
  }
  func.func @transform_0(%arg0: i32, %arg1: i32, %arg2: i32, %arg3: i32) -> (i32, i32, i32) {
    %c0_i32 = arith.constant 0 : i32
    %c0_i32_0 = arith.constant 0 : i32
    return %arg0, %arg3, %c0_i32 : i32, i32, i32
  }
  func.func @transform_1(%arg0: i32, %arg1: i32, %arg2: i32, %arg3: i32) -> (i32, i32) {
    %c0_i32 = arith.constant 0 : i32
    return %arg1, %arg3 : i32, i32
  }
  func.func @transform_2(%arg0: i32, %arg1: i32, %arg2: i32, %arg3: i32) -> (i32, i32) {
    %c0_i32 = arith.constant 0 : i32
    %c0_i32_0 = arith.constant 0 : i32
    return %c0_i32, %arg2 : i32, i32
  }
  func.func @transform_3(%arg0: i32, %arg1: i32, %arg2: i32, %arg3: i32) -> (i32, i32, i32) {
    %c0_i32 = arith.constant 0 : i32
    return %arg0, %arg1, %arg2 : i32, i32, i32
  }
}

</mosaic_0001>

<bundles_post_ra>
// kernel: tpu_custom_call.1
= control target key start
LH: loop header
LB: loop body
LE: loop exit
PB: predicated region body
PF: predicated region fallthrough
CT: control target
= control target key end

     0   :  { %vm132_vm0 = vcmask 130048   ;;  %s1275_s0 = inlined_call_operand.vmem [shape: bf16[2,128,16], index: 0, kind: input, shape index: {}]   ;;  %s1276_s1 = inlined_call_operand.vmem [shape: bf16[128,128], index: 1, kind: input, shape index: {}]   ;;  %s1277_s2 = inlined_call_operand.vmem [shape: bf16[16,128], index: 2, kind: input, shape index: {}]   ;;  %s1278_s3 = inlined_call_operand.hbm [shape: f32[2,128,128], index: 3, kind: output, shape index: {}]  }
   0x1   :  { %v1096_v0 = vld [vmem:[%s1277_s2] sm:$0xff]   ;;  %v1098_v2 = vld [vmem:[%s1275_s0 + $0x8] sm:$0xff]   ;;  %v1099_v3 = vld [vmem:[%s1275_s0 + $0x10] sm:$0xff]  }
   0x2   :  { %v1097_v1 = vld [vmem:[%s1275_s0] sm:$0xff]   ;;  %977 = vmatprep.subr.bf16.mxu0 %v1096_v0  ;;  %v1100_v4 = vld [vmem:[%s1275_s0 + $0x18] sm:$0xff]   ;;  %v1102_v6 = vld [vmem:[%s1275_s0 + $0x28] sm:$0xff]  }
   0x3   :  { %978 = vmatpush3.bf16.msra.mxu0 %v1096_v0  ;;  %979 = vmatprep.mubr.msk.bf16.mxu0 %vm132_vm0, %v1097_v1  ;;  %v1101_v5 = vld [vmem:[%s1275_s0 + $0x20] sm:$0xff]   ;;  %v1103_v7 = vld [vmem:[%s1275_s0 + $0x30] sm:$0xff]  }
   0x4   :  { %1027 = vmatprep.subr.bf16.mxu0 %v1096_v0 }
   0x6   :  { %980 = vmatmul.mubr.msk.bf16.vlgmr.msra.gmra.mrb[0].mxu0 %vm132_vm0, %v1098_v2 }
   0x7   :  { %1028 = vmatpush3.bf16.msra.mxu0 %v1096_v0  ;;  %983 = vmatprep.mubr.msk.bf16.mxu0 %vm132_vm0, %v1099_v3 }
   0xe   :  { %984 = vmatmul.mubr.msk.bf16.gmra.mrb[4].mxu0 %vm132_vm0, %v1100_v4 }
   0xf   :  { %987 = vmatprep.mubr.msk.bf16.mxu0 %vm132_vm0, %v1101_v5 }
  0x16   :  { %988 = vmatmul.mubr.msk.bf16.gmra.mrb[8].mxu0 %vm132_vm0, %v1102_v6 }
  0x17   :  { %8 = vsyncpa [#allocation4], 0  ;;  %991 = vmatprep.mubr.msk.bf16.mxu0 %vm132_vm0, %v1103_v7  ;;  %v1104_v8 = vld [vmem:[%s1275_s0 + $0x38] sm:$0xff]   ;;  %v1105_v9 = vld [vmem:[%s1275_s0 + $0x40] sm:$0xff]  }
  0x18   :  { %v1106_v10 = vld [vmem:[%s1275_s0 + $0x48] sm:$0xff]   ;;  %v1107_v11 = vld [vmem:[%s1275_s0 + $0x50] sm:$0xff]   ;;  %v1108_v12 = vld [vmem:[%s1275_s0 + $0x58] sm:$0xff]  }
  0x19   :  { %v1109_v13 = vld [vmem:[%s1275_s0 + $0x60] sm:$0xff]   ;;  %v1110_v14 = vld [vmem:[%s1275_s0 + $0x68] sm:$0xff]   ;;  %v1111_v15 = vld [vmem:[%s1275_s0 + $0x70] sm:$0xff]  }
  0x1a   :  { %v1112_v16 = vld [vmem:[%s1275_s0 + $0x78] sm:$0xff]   ;;  %v1113_v17 = vld [vmem:[%s1276_s1] sm:$0xff]   ;;  %v1241_v45 = vld [vmem:[%s1276_s1 + $0x8] sm:$0xff]  }
  0x1b   :  { %1011 = vmatprep.mubr.bf16.mxu1 %v1113_v17  ;;  %v1115_v49 = vld [vmem:[%s1276_s1 + $0x10] sm:$0xff]   ;;  %v1116_v53 = vld [vmem:[%s1276_s1 + $0x18] sm:$0xff]   ;;  %v1117_v57 = vld [vmem:[%s1276_s1 + $0x20] sm:$0xff]  }
  0x1c   :  { %v1118_v61 = vld [vmem:[%s1276_s1 + $0x28] sm:$0xff]   ;;  %v1119_v1 = vld [vmem:[%s1276_s1 + $0x30] sm:$0xff]   ;;  %v1120_v5 = vld [vmem:[%s1276_s1 + $0x38] sm:$0xff]   ;;  %s1145_s1 = smov [#allocation3]  }
  0x1d   :  { %s859_s5 = sshll.u32 %s1145_s1, 4  ;;  %s860_s5 = int_to_ptr.vmem [resolvable:$true] %s859_s5 }
  0x1e   :  { %992 = vmatmul.mubr.msk.bf16.gmra.mrb[12].mxu0 %vm132_vm0, %v1104_v8  ;;  %s1121_s6 = scalar_lea.vmem %s860_s5, 4096  ;;  %p1126_p1 = scmp.lt.s32.totalorder %s860_s5, %s860_s5 }
  0x1f   :  { %1029 = vmatprep.mubr.msk.bf16.mxu0 %vm132_vm0, %v1105_v9  ;;  %p1122_p0 = scmp.ne.s32.totalorder %s860_s5, %s1121_s6  ;;  %p1127_p2 = scmp.lt.s32.totalorder %s1121_s6, %s1121_s6 }
  0x21   :  { %p1128_p3 = por %p1127_p2, %p1126_p1 }
  0x23   :  { %p1129_p4 = pnand %p1128_p3, %p1122_p0 }
  0x26   :  { %1030 = vmatmul.mubr.msk.bf16.vlgmr.msra.gmra.mrb[16].mxu0 %vm132_vm0, %v1106_v10 }
  0x27   :  { %1033 = vmatprep.mubr.msk.bf16.mxu0 %vm132_vm0, %v1107_v11 }
  0x2e   :  { %1034 = vmatmul.mubr.msk.bf16.gmra.mrb[20].mxu0 %vm132_vm0, %v1108_v12 }
  0x2f   :  { %1037 = vmatprep.mubr.msk.bf16.mxu0 %vm132_vm0, %v1109_v13 }
  0x36   :  { %1038 = vmatmul.mubr.msk.bf16.gmra.mrb[24].mxu0 %vm132_vm0, %v1110_v14 }
  0x37   :  { %1041 = vmatprep.mubr.msk.bf16.mxu0 %vm132_vm0, %v1111_v15 }
  0x3e   :  { %1042 = vmatmul.mubr.msk.bf16.gmra.mrb[28].mxu0 %vm132_vm0, %v1112_v16 }
  0x3f   :  { %1061 = vmatprep.mubr.bf16.mxu0 %v1113_v17 }
  0xd9   :  { %v981_v18 = vpop.f32.mrb[0].mxu0 }
  0xda   :  { %v191_v19 = vpop.f32.mrb[1].mxu0 }
  0xdb   :  { %v982_v20 = vpop.f32.mrb[2].mxu0 }
  0xdc   :  { %v255_v21 = vpack.c.bf16 %v982_v20, %v981_v18  ;;  %v194_v22 = vpop.f32.mrb[3].mxu0 }
  0xdd   :  { %v254_v23 = vpack.c.bf16 %v194_v22, %v191_v19 }
  0xdf   :  { %995 = vmatprep.subr.bf16.mxu1 %v254_v23 }
  0xe0   :  { %996 = vmatpush3.bf16.msra.mxu1 %v254_v23 }
  0xe1   :  { %v985_v24 = vpop.f32.mrb[4].mxu0  ;;  %997 = vmatprep.subr.bf16.mxu1 %v255_v21 }
  0xe2   :  { %v207_v25 = vpop.f32.mrb[5].mxu0 }
  0xe3   :  { %v986_v26 = vpop.f32.mrb[6].mxu0 }
  0xe4   :  { %v257_v27 = vpack.c.bf16 %v986_v26, %v985_v24  ;;  %v210_v28 = vpop.f32.mrb[7].mxu0  ;;  %998 = vmatpush3.bf16.msra.mxu1 %v255_v21 }
  0xe5   :  { %v256_v29 = vpack.c.bf16 %v210_v28, %v207_v25 }
  0xe7   :  { %999 = vmatprep.subr.bf16.mxu1 %v256_v29 }
  0xe8   :  { %1000 = vmatpush3.bf16.msra.mxu1 %v256_v29 }
  0xe9   :  { %v989_v30 = vpop.f32.mrb[8].mxu0  ;;  %1001 = vmatprep.subr.bf16.mxu1 %v257_v27 }
  0xea   :  { %v223_v31 = vpop.f32.mrb[9].mxu0 }
  0xeb   :  { %v990_v32 = vpop.f32.mrb[10].mxu0 }
  0xec   :  { %v259_v33 = vpack.c.bf16 %v990_v32, %v989_v30  ;;  %v226_v34 = vpop.f32.mrb[11].mxu0  ;;  %1002 = vmatpush3.bf16.msra.mxu1 %v257_v27 }
  0xed   :  { %v258_v35 = vpack.c.bf16 %v226_v34, %v223_v31 }
  0xef   :  { %1003 = vmatprep.subr.bf16.mxu1 %v258_v35 }
  0xf0   :  { %1004 = vmatpush3.bf16.msra.mxu1 %v258_v35 }
  0xf1   :  { %v993_v36 = vpop.f32.mrb[12].mxu0  ;;  %1005 = vmatprep.subr.bf16.mxu1 %v259_v33 }
  0xf2   :  { %v239_v37 = vpop.f32.mrb[13].mxu0 }
  0xf3   :  { %v994_v38 = vpop.f32.mrb[14].mxu0 }
  0xf4   :  { %v261_v39 = vpack.c.bf16 %v994_v38, %v993_v36  ;;  %v242_v40 = vpop.f32.mrb[15].mxu0  ;;  %1006 = vmatpush3.bf16.msra.mxu1 %v259_v33 }
  0xf5   :  { %v260_v41 = vpack.c.bf16 %v242_v40, %v239_v37 }
  0xf7   :  { %1007 = vmatprep.subr.bf16.mxu1 %v260_v41 }
  0xf8   :  { %1008 = vmatpush3.bf16.msra.mxu1 %v260_v41 }
  0xf9   :  { %1009 = vmatprep.subr.bf16.mxu1 %v261_v39  ;;  %v1031_v42 = vpop.f32.mrb[16].mxu0 }
  0xfa   :  { %v570_v43 = vpop.f32.mrb[17].mxu0 }
  0xfb   :  { %v1032_v44 = vpop.f32.mrb[18].mxu0 }
  0xfc   :  { %v634_v46 = vpack.c.bf16 %v1032_v44, %v1031_v42  ;;  %1010 = vmatpush3.bf16.msra.mxu1 %v261_v39  ;;  %v573_v47 = vpop.f32.mrb[19].mxu0 }
  0xfd   :  { %v633_v48 = vpack.c.bf16 %v573_v47, %v570_v43 }
  0xff   :  { %1012 = vmatmul.mubr.bf16.vlgmr.msra.gmra.mrb[0].mxu1 %v1241_v45  ;;  %1045 = vmatprep.subr.bf16.mxu0 %v633_v48 }
 0x100   :  { %1077 = vmatprep.subr.bf16.mxu1 %v633_v48  ;;  %1046 = vmatpush3.bf16.msra.mxu0 %v633_v48 }
 0x101   :  { %1085 = vmatpush3.bf16.msra.mxu1 %v633_v48  ;;  %v1035_v50 = vpop.f32.mrb[20].mxu0  ;;  %1047 = vmatprep.subr.bf16.mxu0 %v634_v46 }
 0x102   :  { %1078 = vmatprep.subr.bf16.mxu1 %v634_v46  ;;  %v586_v51 = vpop.f32.mrb[21].mxu0  ;;  %1015 = vmatprep.mubr.bf16.mxu1 %v1115_v49 }
 0x103   :  { %v1036_v52 = vpop.f32.mrb[22].mxu0 }
 0x104   :  { %v636_v54 = vpack.c.bf16 %v1036_v52, %v1035_v50  ;;  %v589_v55 = vpop.f32.mrb[23].mxu0  ;;  %1048 = vmatpush3.bf16.msra.mxu0 %v634_v46 }
 0x105   :  { %v635_v56 = vpack.c.bf16 %v589_v55, %v586_v51  ;;  %1086 = vmatpush3.bf16.msra.mxu1 %v634_v46 }
 0x107   :  { %1016 = vmatmul.mubr.bf16.gmra.mrb[4].mxu1 %v1116_v53  ;;  %1049 = vmatprep.subr.bf16.mxu0 %v635_v56 }
 0x108   :  { %1079 = vmatprep.subr.bf16.mxu1 %v635_v56  ;;  %1050 = vmatpush3.bf16.msra.mxu0 %v635_v56 }
 0x109   :  { %1087 = vmatpush3.bf16.msra.mxu1 %v635_v56  ;;  %v1039_v58 = vpop.f32.mrb[24].mxu0  ;;  %1051 = vmatprep.subr.bf16.mxu0 %v636_v54 }
 0x10a   :  { %1080 = vmatprep.subr.bf16.mxu1 %v636_v54  ;;  %v602_v59 = vpop.f32.mrb[25].mxu0  ;;  %1019 = vmatprep.mubr.bf16.mxu1 %v1117_v57 }
 0x10b   :  { %v1040_v60 = vpop.f32.mrb[26].mxu0 }
 0x10c   :  { %v638_v62 = vpack.c.bf16 %v1040_v60, %v1039_v58  ;;  %v605_v63 = vpop.f32.mrb[27].mxu0  ;;  %1052 = vmatpush3.bf16.msra.mxu0 %v636_v54 }
 0x10d   :  { %v637_v0 = vpack.c.bf16 %v605_v63, %v602_v59  ;;  %1088 = vmatpush3.bf16.msra.mxu1 %v636_v54 }
 0x10f   :  { %1020 = vmatmul.mubr.bf16.gmra.mrb[8].mxu1 %v1118_v61  ;;  %1053 = vmatprep.subr.bf16.mxu0 %v637_v0 }
 0x110   :  { %1081 = vmatprep.subr.bf16.mxu1 %v637_v0  ;;  %1054 = vmatpush3.bf16.msra.mxu0 %v637_v0 }
 0x111   :  { %1089 = vmatpush3.bf16.msra.mxu1 %v637_v0  ;;  %v1043_v2 = vpop.f32.mrb[28].mxu0  ;;  %1055 = vmatprep.subr.bf16.mxu0 %v638_v62 }
 0x112   :  { %1082 = vmatprep.subr.bf16.mxu1 %v638_v62  ;;  %v618_v3 = vpop.f32.mrb[29].mxu0  ;;  %1023 = vmatprep.mubr.bf16.mxu1 %v1119_v1 }
 0x113   :  { %v1044_v4 = vpop.f32.mrb[30].mxu0 }
 0x114   :  { %v640_v6 = vpack.c.bf16 %v1044_v4, %v1043_v2  ;;  %v621_v7 = vpop.f32.mrb[31].mxu0  ;;  %1056 = vmatpush3.bf16.msra.mxu0 %v638_v62 }
 0x115   :  { %v639_v8 = vpack.c.bf16 %v621_v7, %v618_v3  ;;  %1090 = vmatpush3.bf16.msra.mxu1 %v638_v62 }
 0x117   :  { %1024 = vmatmul.mubr.bf16.gmra.mrb[12].mxu1 %v1120_v5  ;;  %1057 = vmatprep.subr.bf16.mxu0 %v639_v8 }
 0x118   :  { %1083 = vmatprep.subr.bf16.mxu1 %v639_v8  ;;  %1058 = vmatpush3.bf16.msra.mxu0 %v639_v8 }
 0x119   :  { %1091 = vmatpush3.bf16.msra.mxu1 %v639_v8  ;;  %1059 = vmatprep.subr.bf16.mxu0 %v640_v6 }
 0x11a   :  { %1084 = vmatprep.subr.bf16.mxu1 %v640_v6  ;;  %1065 = vmatprep.mubr.bf16.mxu1 %v1115_v49 }
 0x11c   :  { %1060 = vmatpush3.bf16.msra.mxu0 %v640_v6 }
 0x11d   :  { %1092 = vmatpush3.bf16.msra.mxu1 %v640_v6 }
 0x11f   :  { %1062 = vmatmul.mubr.bf16.vlgmr.msra.gmra.mrb[32].mxu0 %v1241_v45 }
 0x120   :  { %1066 = vmatmul.mubr.bf16.vlgmr.msra.gmra.mrb[16].mxu1 %v1116_v53 }
 0x121   :  { %1069 = vmatprep.mubr.bf16.mxu1 %v1117_v57 }
 0x128   :  { %1070 = vmatmul.mubr.bf16.gmra.mrb[20].mxu1 %v1118_v61 }
 0x129   :  { %1073 = vmatprep.mubr.bf16.mxu1 %v1119_v1 }
 0x130   :  { %1074 = vmatmul.mubr.bf16.gmra.mrb[24].mxu1 %v1120_v5 }
 0x1d2   :  { %v1013_v9 = vpop.f32.mrb[0].mxu1 }
 0x1d3   :  { %824 = vst [vmem:[#allocation3 + $0x10] sm:$0xff] %v1013_v9  ;;  %v360_v10 = vpop.f32.mrb[1].mxu1 }
 0x1d4   :  { %822 = vst [vmem:[#allocation3] sm:$0xff] %v360_v10  ;;  %v1014_v11 = vpop.f32.mrb[2].mxu1 }
 0x1d5   :  { %825 = vst [vmem:[#allocation3 + $0x18] sm:$0xff] %v1014_v11  ;;  %v363_v12 = vpop.f32.mrb[3].mxu1 }
 0x1d6   :  { %823 = vst [vmem:[#allocation3 + $0x8] sm:$0xff] %v363_v12 }
 0x1da   :  { %v1017_v13 = vpop.f32.mrb[4].mxu1 }
 0x1db   :  { %828 = vst [vmem:[#allocation3 + $0x30] sm:$0xff] %v1017_v13  ;;  %v376_v14 = vpop.f32.mrb[5].mxu1 }
 0x1dc   :  { %826 = vst [vmem:[#allocation3 + $0x20] sm:$0xff] %v376_v14  ;;  %v1018_v15 = vpop.f32.mrb[6].mxu1 }
 0x1dd   :  { %829 = vst [vmem:[#allocation3 + $0x38] sm:$0xff] %v1018_v15  ;;  %v379_v16 = vpop.f32.mrb[7].mxu1 }
 0x1de   :  { %827 = vst [vmem:[#allocation3 + $0x28] sm:$0xff] %v379_v16 }
 0x1e2   :  { %v1021_v17 = vpop.f32.mrb[8].mxu1 }
 0x1e3   :  { %832 = vst [vmem:[#allocation3 + $0x50] sm:$0xff] %v1021_v17  ;;  %v392_v18 = vpop.f32.mrb[9].mxu1 }
 0x1e4   :  { %830 = vst [vmem:[#allocation3 + $0x40] sm:$0xff] %v392_v18  ;;  %v1022_v19 = vpop.f32.mrb[10].mxu1 }
 0x1e5   :  { %833 = vst [vmem:[#allocation3 + $0x58] sm:$0xff] %v1022_v19  ;;  %v395_v20 = vpop.f32.mrb[11].mxu1 }
 0x1e6   :  { %831 = vst [vmem:[#allocation3 + $0x48] sm:$0xff] %v395_v20 }
 0x1ea   :  { %v1025_v21 = vpop.f32.mrb[12].mxu1 }
 0x1eb   :  { %836 = vst [vmem:[#allocation3 + $0x70] sm:$0xff] %v1025_v21  ;;  %v408_v22 = vpop.f32.mrb[13].mxu1 }
 0x1ec   :  { %834 = vst [vmem:[#allocation3 + $0x60] sm:$0xff] %v408_v22  ;;  %v1026_v23 = vpop.f32.mrb[14].mxu1 }
 0x1ed   :  { %837 = vst [vmem:[#allocation3 + $0x78] sm:$0xff] %v1026_v23  ;;  %v411_v24 = vpop.f32.mrb[15].mxu1 }
 0x1ee   :  { %835 = vst [vmem:[#allocation3 + $0x68] sm:$0xff] %v411_v24 }
 0x1f2   :  { %v1063_v25 = vpop.f32.mrb[32].mxu0 }
 0x1f3   :  { %v1067_v26 = vpop.f32.mrb[16].mxu1  ;;  %840 = vst [vmem:[#allocation3 + $0x90] sm:$0xff] %v1063_v25  ;;  %v692_v27 = vpop.f32.mrb[33].mxu0 }
 0x1f4   :  { %844 = vst [vmem:[#allocation3 + $0xb0] sm:$0xff] %v1067_v26  ;;  %v708_v28 = vpop.f32.mrb[17].mxu1  ;;  %838 = vst [vmem:[#allocation3 + $0x80] sm:$0xff] %v692_v27  ;;  %v1064_v29 = vpop.f32.mrb[34].mxu0 }
 0x1f5   :  { %842 = vst [vmem:[#allocation3 + $0xa0] sm:$0xff] %v708_v28  ;;  %v1068_v30 = vpop.f32.mrb[18].mxu1  ;;  %841 = vst [vmem:[#allocation3 + $0x98] sm:$0xff] %v1064_v29  ;;  %v695_v31 = vpop.f32.mrb[35].mxu0 }
 0x1f6   :  { %845 = vst [vmem:[#allocation3 + $0xb8] sm:$0xff] %v1068_v30  ;;  %v711_v32 = vpop.f32.mrb[19].mxu1  ;;  %839 = vst [vmem:[#allocation3 + $0x88] sm:$0xff] %v695_v31 }
 0x1f7   :  { %843 = vst [vmem:[#allocation3 + $0xa8] sm:$0xff] %v711_v32 }
 0x1fb   :  { %v1071_v33 = vpop.f32.mrb[20].mxu1 }
 0x1fc   :  { %848 = vst [vmem:[#allocation3 + $0xd0] sm:$0xff] %v1071_v33  ;;  %v724_v34 = vpop.f32.mrb[21].mxu1 }
 0x1fd   :  { %846 = vst [vmem:[#allocation3 + $0xc0] sm:$0xff] %v724_v34  ;;  %v1072_v35 = vpop.f32.mrb[22].mxu1 }
 0x1fe   :  { %849 = vst [vmem:[#allocation3 + $0xd8] sm:$0xff] %v1072_v35  ;;  %v727_v36 = vpop.f32.mrb[23].mxu1 }
 0x1ff   :  { %847 = vst [vmem:[#allocation3 + $0xc8] sm:$0xff] %v727_v36 }
 0x203   :  { %v1075_v37 = vpop.f32.mrb[24].mxu1 }
 0x204   :  { %852 = vst [vmem:[#allocation3 + $0xf0] sm:$0xff] %v1075_v37  ;;  %v740_v38 = vpop.f32.mrb[25].mxu1 }
 0x205   :  { %850 = vst [vmem:[#allocation3 + $0xe0] sm:$0xff] %v740_v38  ;;  %v1076_v39 = vpop.f32.mrb[26].mxu1 }
 0x206   :  { %853 = vst [vmem:[#allocation3 + $0xf8] sm:$0xff] %v1076_v39  ;;  %v743_v40 = vpop.f32.mrb[27].mxu1 }
 0x207   :  { %851 = vst [vmem:[#allocation3 + $0xe8] sm:$0xff] %v743_v40 }
 0x208   :  { %1132 = shalt.err (!%p1129_p4)
}
 0x209   :  { %s1133_s9 = scalar_lea.hbm %s1278_s3, 4096 }
 0x20a   :  { %p1134_p5 = scmp.ne.s32.totalorder %s1278_s3, %s1133_s9  ;;  %p1137_p6 = scmp.lt.u32.totalorder %s1133_s9, %s1278_s3 }
 0x20c   :  { %p1139_p7 = pnand %p1137_p6, %p1134_p5 }
 0x20e   :  { %1142 = shalt.err (!%p1139_p7)
}
 0x20f   :  { %s1146_s14 = smov 128   ;;  %s1147_s15 = smov 8  }
 0x210   :  { %865 = dma.vmem_to_hbm [thread:$0]  %s860_s5, 4096, %s1278_s3, [#allocation4], %s1146_s14, %s1146_s14, %s1147_s15  }
 0x211   :  { %1143 = dma.done.wait [#allocation4], 4096  }
 0x212   :  { %1144 = vsyncadd [#allocation4], 4294963200 }
 0x213   :  { %869 = vsyncpa [#allocation4], 1 }

</bundles_post_ra>
